<compile_context>
chip_gen: v7x
topology: tpu7x:2x2x1
jax: 0.10.0
libtpu: 0.0.40
codegen_flags: <defaults>
</compile_context>

<pallas_src>
import math

import jax
import jax.numpy as jnp
from jax.experimental import pallas as pl
from jax.experimental.pallas import tpu as pltpu

_LANE = 128       # lane width (last dim)
_SUBLANE = 8      # f32 sublane width (second-to-last dim)
_IN_PAD = 16      # input-feature pad (bf16 sublane packing safe), cheap

_SUPPORTED_ACTS = ("relu", "tanh", "identity")


def _round_up(n, m):
    return ((n + m - 1) // m) * m


# ----------------------------------------------------------------------------
# Kernel
# ----------------------------------------------------------------------------
def _make_fused_mlp_kernel(n_layers, activations):
    """Kernel refs: (x, w0, b0, w1, b1, ..., o).  Everything resident in VMEM."""

    def kernel(*refs):
        x_ref = refs[0]
        o_ref = refs[-1]
        x = x_ref[...]                                    # (TB, D0p) f32
        for i in range(n_layers):
            w = refs[1 + 2 * i][...]                      # (D_i_p, D_{i+1}_p), matmul dtype
            b = refs[2 + 2 * i][...]                      # (1,     D_{i+1}_p), f32
            # MXU in the weights' dtype (bf16 fast path), f32 accumulation;
            # bias add + activation stay in f32 (v5e VPU/EUP lack bf16).
            x = jnp.dot(x.astype(w.dtype), w,
                        preferred_element_type=jnp.float32) + b
            act = activations[i]
            if act == "relu":
                x = jnp.maximum(x, 0.0)
            elif act == "tanh":
                x = jnp.tanh(x)
            # "identity": no-op
        o_ref[...] = x.astype(o_ref.dtype)

    return kernel


# ----------------------------------------------------------------------------
# Parameter preparation (runs ONCE, hoisted out of the per-call path)
# ----------------------------------------------------------------------------
def prepare_mlp(params, activations, *, matmul_dtype=jnp.bfloat16):
    """Pad weights/biases once and cast weights to the MXU dtype.

    params      : list of (w, b) with w of shape (in, out), b of shape (out,)
    activations : list of "relu" | "tanh" | "identity" (one per layer)
    """
    assert len(params) == len(activations) >= 1
    for a in activations:
        assert a in _SUPPORTED_ACTS, f"unsupported activation: {a}"

    dims = [params[0][0].shape[0]] + [w.shape[1] for (w, _) in params]
    for i, (w, b) in enumerate(params):
        assert w.shape == (dims[i], dims[i + 1]) and b.shape == (dims[i + 1],)

    # Input dim: sublane-aligned only (layer-0 K kept at true width).
    # Hidden/output dims: lane-aligned (128).  Zero padding is exact for
    # matmul + bias + relu/tanh/identity; padded rows/cols are sliced off.
    pdims = [_round_up(dims[0], _IN_PAD)] + [_round_up(d, _LANE) for d in dims[1:]]

    weights, biases = [], []
    for i, (w, b) in enumerate(params):
        wp = jnp.zeros((pdims[i], pdims[i + 1]), matmul_dtype)
        wp = wp.at[:dims[i], :dims[i + 1]].set(w.astype(matmul_dtype))
        bp = jnp.zeros((1, pdims[i + 1]), jnp.float32)
        bp = bp.at[0, :dims[i + 1]].set(b.astype(jnp.float32))
        weights.append(wp)
        biases.append(bp)

    return dict(
        n_layers=len(params),
        activations=tuple(activations),
        dims=tuple(dims),
        pdims=tuple(pdims),
        weights=tuple(weights),
        biases=tuple(biases),
    )


# ----------------------------------------------------------------------------
# Tiling / VMEM helpers
# ----------------------------------------------------------------------------
def _choose_tb(batch, tb_max):
    """Batch tile: <= tb_max (vreg pressure), minimal batch padding."""
    tb_max = max(_SUBLANE, _round_up(min(tb_max, 256), _SUBLANE))
    b8 = _round_up(batch, _SUBLANE)
    if b8 <= tb_max:
        return b8                       # single tile covers the whole batch
    for tb in (256, 128, 64, 32, 16, 8):
        if tb <= tb_max and (_round_up(batch, tb) - batch) <= max(batch // 8, _SUBLANE):
            return tb
    return _SUBLANE


def _vmem_limit_bytes(prep, tb, single_buffer_weights):
    """Explicit VMEM accounting (v7x: 64 MiB/TC; v5e scoped default 16 MiB)."""
    wbuf = 1 if single_buffer_weights else 2
    w_bytes = sum(int(w.size) * w.dtype.itemsize for w in prep["weights"])
    b_bytes = sum(int(b.size) * b.dtype.itemsize for b in prep["biases"])
    io_bytes = 2 * tb * (prep["pdims"][0] + prep["pdims"][-1]) * 4   # double-buffered x / out tiles
    act_bytes = 2 * tb * max(prep["pdims"]) * 4                      # live inter-layer activations (slack)
    need = wbuf * (w_bytes + b_bytes) + io_bytes + act_bytes
    # TODO(synk): once pinned weights alone approach the per-TC budget
    # (v5e 16 MiB scoped / v7x 64 MiB physical), switch the largest layers to
    # streamed weight tiles (extra grid axis or pltpu.emit_pipeline).
    return int(min(64 * 1024 * 1024, max(2 * need, 16 * 1024 * 1024)))


def _pinned_spec(shape, single_buffer):
    """Grid-invariant (weight/bias) block: same block every grid step."""
    index_map = lambda i: (0, 0)
    if single_buffer:
        try:
            # Double-buffering a constant block is pure VMEM waste.
            return pl.BlockSpec(shape, index_map, pipeline_mode=pl.Buffered(1))
        except (TypeError, AttributeError):
            pass
    return pl.BlockSpec(shape, index_map)


# ----------------------------------------------------------------------------
# Forward pass: one fused pallas_call for the whole MLP
# ----------------------------------------------------------------------------
def mlp_forward(prep, x, *, tb_max=256):
    dims, pdims = prep["dims"], prep["pdims"]
    B, d_in = x.shape
    assert d_in == dims[0]

    tb = _choose_tb(B, tb_max)
    Bp = _round_up(B, tb)

    if Bp == B and pdims[0] == dims[0]:
        xp = x.astype(jnp.float32)
    else:
        xp = jnp.zeros((Bp, pdims[0]), jnp.float32).at[:B, :dims[0]].set(x)

    flat_inputs = [xp]
    for w, b in zip(prep["weights"], prep["biases"]):
        flat_inputs += [w, b]

    kernel = _make_fused_mlp_kernel(prep["n_layers"], prep["activations"])

    def run(single_buffer_weights):
        in_specs = [pl.BlockSpec((tb, pdims[0]), lambda i: (i, 0))]
        for li in range(prep["n_layers"]):
            in_specs.append(_pinned_spec((pdims[li], pdims[li + 1]), single_buffer_weights))
            in_specs.append(_pinned_spec((1, pdims[li + 1]), single_buffer_weights))
        out = pl.pallas_call(
            kernel,
            out_shape=jax.ShapeDtypeStruct((Bp, pdims[-1]), jnp.float32),
            grid=(Bp // tb,),
            in_specs=in_specs,
            out_specs=pl.BlockSpec((tb, pdims[-1]), lambda i: (i, 0)),
            compiler_params=pltpu.CompilerParams(
                dimension_semantics=("parallel",),
                vmem_limit_bytes=_vmem_limit_bytes(prep, tb, single_buffer_weights),
            ),
        )(*flat_inputs)
        return jax.block_until_ready(out)

    try:
        out_p = run(single_buffer_weights=True)
    except Exception:
        # Fallback if single-buffered pipeline_mode is unsupported in this
        # jax build: use default (double-buffered) weight blocks.
        out_p = run(single_buffer_weights=False)

    return out_p[:B, :dims[-1]]


# ----------------------------------------------------------------------------
# Init / reference / test
# ----------------------------------------------------------------------------
def init_mlp_params(key, size_h_layers):
    """Deterministic init mimicking torch.nn.Linear default (+/- 1/sqrt(fan_in))."""
    params = []
    for i in range(len(size_h_layers) - 1):
        fan_in, fan_out = size_h_layers[i], size_h_layers[i + 1]
        key, kw, kb = jax.random.split(key, 3)
        bound = 1.0 / math.sqrt(fan_in)
        w = jax.random.uniform(kw, (fan_in, fan_out), jnp.float32, -bound, bound)
        b = jax.random.uniform(kb, (fan_out,), jnp.float32, -bound, bound)
        params.append((w, b))
    return params


def _mlp_reference(params, activations, x):
    """Pure-JAX reference for correctness checking."""
    for (w, b), act in zip(params, activations):
        x = x @ w + b
        if act == "relu":
            x = jnp.maximum(x, 0.0)
        elif act == "tanh":
            x = jnp.tanh(x)
    return x


if __name__ == "__main__":
    # Module config: size_h_layers = [32, 64, 64, 16],
    # activations = [nn.ReLU(), nn.Tanh(), nn.Identity()]
    size_h_layers = [32, 64, 64, 16]
    activations = ["relu", "tanh", "identity"]

    key = jax.random.PRNGKey(0)
    key, kx = jax.random.split(key)
    batch = 8
    x = jax.random.normal(kx, (batch, size_h_layers[0]), dtype=jnp.float32)

    params = init_mlp_params(key, size_h_layers)
    ref = _mlp_reference(params, activations, x)

    # 1) exact-precision path (f32 weights on the MXU) -- tight tolerance.
    prep_f32 = prepare_mlp(params, activations, matmul_dtype=jnp.float32)
    out_f32 = jax.block_until_ready(mlp_forward(prep_f32, x))
    assert out_f32.shape == (batch, size_h_layers[-1])
    assert out_f32.dtype == jnp.float32
    assert jnp.allclose(out_f32, ref, atol=1e-5, rtol=1e-5)

    # 2) bf16-matmul fast path (default) -- f32 accumulate, looser tolerance.
    prep_bf16 = prepare_mlp(params, activations, matmul_dtype=jnp.bfloat16)
    out_bf16 = jax.block_until_ready(mlp_forward(prep_bf16, x))
    assert out_bf16.shape == (batch, size_h_layers[-1])
    assert out_bf16.dtype == jnp.float32
    assert jnp.allclose(out_bf16, ref, atol=3e-2, rtol=3e-2)

    print("KERNEL_OK")
</pallas_src>

<mosaic_0001>
module attributes {stable_mosaic.version = 11 : i64} {
  func.func @kernel(%arg0: i32, %arg1: memref<8x32xf32, #tpu.memory_space<vmem>>, %arg2: memref<32x128xf32, #tpu.memory_space<vmem>>, %arg3: memref<1x128xf32, #tpu.memory_space<vmem>>, %arg4: memref<128x128xf32, #tpu.memory_space<vmem>>, %arg5: memref<1x128xf32, #tpu.memory_space<vmem>>, %arg6: memref<128x128xf32, #tpu.memory_space<vmem>>, %arg7: memref<1x128xf32, #tpu.memory_space<vmem>>, %arg8: memref<8x128xf32, #tpu.memory_space<vmem>>) attributes {dimension_semantics = [#tpu.dimension_semantics<parallel>], iteration_bounds = array<i64: 1>, scalar_prefetch = 0 : i64, scratch_operands = 0 : i64, tpu.core_type = #tpu.core_type<tc>, window_params = [{transform_indices = @transform_0, window_bounds = array<i64: 8, 32>}, {pipeline_mode = #tpu.pipeline_mode<synchronous>, transform_indices = @transform_1, window_bounds = array<i64: 32, 128>}, {pipeline_mode = #tpu.pipeline_mode<synchronous>, transform_indices = @transform_2, window_bounds = array<i64: 1, 128>}, {pipeline_mode = #tpu.pipeline_mode<synchronous>, transform_indices = @transform_3, window_bounds = array<i64: 128, 128>}, {pipeline_mode = #tpu.pipeline_mode<synchronous>, transform_indices = @transform_4, window_bounds = array<i64: 1, 128>}, {pipeline_mode = #tpu.pipeline_mode<synchronous>, transform_indices = @transform_5, window_bounds = array<i64: 128, 128>}, {pipeline_mode = #tpu.pipeline_mode<synchronous>, transform_indices = @transform_6, window_bounds = array<i64: 1, 128>}, {transform_indices = @transform_7, window_bounds = array<i64: 8, 128>}]} {
    %c0 = arith.constant 0 : index
    %c0_0 = arith.constant 0 : index
    %0 = vector.load %arg1[%c0, %c0_0] : memref<8x32xf32, #tpu.memory_space<vmem>>, vector<8x32xf32>
    %c0_1 = arith.constant 0 : index
    %c0_2 = arith.constant 0 : index
    %1 = vector.load %arg2[%c0_1, %c0_2] : memref<32x128xf32, #tpu.memory_space<vmem>>, vector<32x128xf32>
    %c0_3 = arith.constant 0 : index
    %c0_4 = arith.constant 0 : index
    %2 = vector.load %arg3[%c0_3, %c0_4] : memref<1x128xf32, #tpu.memory_space<vmem>>, vector<1x128xf32>
    %cst = arith.constant dense<0.000000e+00> : vector<8x128xf32>
    %3 = tpu.matmul %0, %1, %cst {dimension_numbers = #tpu.dot_dimension_numbers<[1], [0], [0], [1], [0, 0, 1, 1], [], []>} : vector<8x32xf32>, vector<32x128xf32>, vector<8x128xf32> -> vector<8x128xf32>
    %4 = vector.broadcast %2 : vector<1x128xf32> to vector<8x128xf32>
    %5 = arith.addf %3, %4 : vector<8x128xf32>
    %cst_5 = arith.constant 0.000000e+00 : f32
    %6 = vector.broadcast %cst_5 : f32 to vector<8x128xf32>
    %7 = arith.maximumf %5, %6 : vector<8x128xf32>
    %c0_6 = arith.constant 0 : index
    %c0_7 = arith.constant 0 : index
    %8 = vector.load %arg4[%c0_6, %c0_7] : memref<128x128xf32, #tpu.memory_space<vmem>>, vector<128x128xf32>
    %c0_8 = arith.constant 0 : index
    %c0_9 = arith.constant 0 : index
    %9 = vector.load %arg5[%c0_8, %c0_9] : memref<1x128xf32, #tpu.memory_space<vmem>>, vector<1x128xf32>
    %cst_10 = arith.constant dense<0.000000e+00> : vector<8x128xf32>
    %10 = tpu.matmul %7, %8, %cst_10 {dimension_numbers = #tpu.dot_dimension_numbers<[1], [0], [0], [1], [0, 0, 1, 1], [], []>} : vector<8x128xf32>, vector<128x128xf32>, vector<8x128xf32> -> vector<8x128xf32>
    %11 = vector.broadcast %9 : vector<1x128xf32> to vector<8x128xf32>
    %12 = arith.addf %10, %11 : vector<8x128xf32>
    %13 = math.tanh %12 : vector<8x128xf32>
    %c0_11 = arith.constant 0 : index
    %c0_12 = arith.constant 0 : index
    %14 = vector.load %arg6[%c0_11, %c0_12] : memref<128x128xf32, #tpu.memory_space<vmem>>, vector<128x128xf32>
    %c0_13 = arith.constant 0 : index
    %c0_14 = arith.constant 0 : index
    %15 = vector.load %arg7[%c0_13, %c0_14] : memref<1x128xf32, #tpu.memory_space<vmem>>, vector<1x128xf32>
    %cst_15 = arith.constant dense<0.000000e+00> : vector<8x128xf32>
    %16 = tpu.matmul %13, %14, %cst_15 {dimension_numbers = #tpu.dot_dimension_numbers<[1], [0], [0], [1], [0, 0, 1, 1], [], []>} : vector<8x128xf32>, vector<128x128xf32>, vector<8x128xf32> -> vector<8x128xf32>
    %17 = vector.broadcast %15 : vector<1x128xf32> to vector<8x128xf32>
    %18 = arith.addf %16, %17 : vector<8x128xf32>
    %c0_16 = arith.constant 0 : index
    %c0_17 = arith.constant 0 : index
    %19 = vector.load %arg8[%c0_16, %c0_17] : memref<8x128xf32, #tpu.memory_space<vmem>>, vector<8x128xf32>
    tpu.vector_store %arg8[%c0_16, %c0_17], %18 {strides = array<i32>} : memref<8x128xf32, #tpu.memory_space<vmem>>, vector<8x128xf32>,
    return
  }
  func.func @transform_0(%arg0: i32) -> (i32, i32) {
    %c0_i32 = arith.constant 0 : i32
    %c0_i32_0 = arith.constant 0 : i32
    return %arg0, %c0_i32 : i32, i32
  }
  func.func @transform_1(%arg0: i32) -> (i32, i32) {
    %c0_i32 = arith.constant 0 : i32
    %c0_i32_0 = arith.constant 0 : i32
    %c0_i32_1 = arith.constant 0 : i32
    return %c0_i32, %c0_i32_0 : i32, i32
  }
  func.func @transform_2(%arg0: i32) -> (i32, i32) {
    %c0_i32 = arith.constant 0 : i32
    %c0_i32_0 = arith.constant 0 : i32
    %c0_i32_1 = arith.constant 0 : i32
    return %c0_i32, %c0_i32_0 : i32, i32
  }
  func.func @transform_3(%arg0: i32) -> (i32, i32) {
    %c0_i32 = arith.constant 0 : i32
    %c0_i32_0 = arith.constant 0 : i32
    %c0_i32_1 = arith.constant 0 : i32
    return %c0_i32, %c0_i32_0 : i32, i32
  }
  func.func @transform_4(%arg0: i32) -> (i32, i32) {
    %c0_i32 = arith.constant 0 : i32
    %c0_i32_0 = arith.constant 0 : i32
    %c0_i32_1 = arith.constant 0 : i32
    return %c0_i32, %c0_i32_0 : i32, i32
  }
  func.func @transform_5(%arg0: i32) -> (i32, i32) {
    %c0_i32 = arith.constant 0 : i32
    %c0_i32_0 = arith.constant 0 : i32
    %c0_i32_1 = arith.constant 0 : i32
    return %c0_i32, %c0_i32_0 : i32, i32
  }
  func.func @transform_6(%arg0: i32) -> (i32, i32) {
    %c0_i32 = arith.constant 0 : i32
    %c0_i32_0 = arith.constant 0 : i32
    %c0_i32_1 = arith.constant 0 : i32
    return %c0_i32, %c0_i32_0 : i32, i32
  }
  func.func @transform_7(%arg0: i32) -> (i32, i32) {
    %c0_i32 = arith.constant 0 : i32
    %c0_i32_0 = arith.constant 0 : i32
    return %arg0, %c0_i32 : i32, i32
  }
}

module attributes {stable_mosaic.version = 11 : i64} {
  func.func @kernel(%arg0: i32, %arg1: memref<8x32xf32, #tpu.memory_space<vmem>>, %arg2: memref<32x128xf32, #tpu.memory_space<vmem>>, %arg3: memref<1x128xf32, #tpu.memory_space<vmem>>, %arg4: memref<128x128xf32, #tpu.memory_space<vmem>>, %arg5: memref<1x128xf32, #tpu.memory_space<vmem>>, %arg6: memref<128x128xf32, #tpu.memory_space<vmem>>, %arg7: memref<1x128xf32, #tpu.memory_space<vmem>>, %arg8: memref<8x128xf32, #tpu.memory_space<vmem>>) attributes {dimension_semantics = [#tpu.dimension_semantics<parallel>], iteration_bounds = array<i64: 1>, scalar_prefetch = 0 : i64, scratch_operands = 0 : i64, tpu.core_type = #tpu.core_type<tc>, window_params = [{transform_indices = @transform_0, window_bounds = array<i64: 8, 32>}, {pipeline_mode = #tpu.pipeline_mode<synchronous>, transform_indices = @transform_1, window_bounds = array<i64: 32, 128>}, {pipeline_mode = #tpu.pipeline_mode<synchronous>, transform_indices = @transform_2, window_bounds = array<i64: 1, 128>}, {pipeline_mode = #tpu.pipeline_mode<synchronous>, transform_indices = @transform_3, window_bounds = array<i64: 128, 128>}, {pipeline_mode = #tpu.pipeline_mode<synchronous>, transform_indices = @transform_4, window_bounds = array<i64: 1, 128>}, {pipeline_mode = #tpu.pipeline_mode<synchronous>, transform_indices = @transform_5, window_bounds = array<i64: 128, 128>}, {pipeline_mode = #tpu.pipeline_mode<synchronous>, transform_indices = @transform_6, window_bounds = array<i64: 1, 128>}, {transform_indices = @transform_7, window_bounds = array<i64: 8, 128>}]} {
    %c0 = arith.constant 0 : index
    %c0_0 = arith.constant 0 : index
    %0 = vector.load %arg1[%c0, %c0_0] : memref<8x32xf32, #tpu.memory_space<vmem>>, vector<8x32xf32>
    %c0_1 = arith.constant 0 : index
    %c0_2 = arith.constant 0 : index
    %1 = vector.load %arg2[%c0_1, %c0_2] : memref<32x128xf32, #tpu.memory_space<vmem>>, vector<32x128xf32>
    %c0_3 = arith.constant 0 : index
    %c0_4 = arith.constant 0 : index
    %2 = vector.load %arg3[%c0_3, %c0_4] : memref<1x128xf32, #tpu.memory_space<vmem>>, vector<1x128xf32>
    %cst = arith.constant dense<0.000000e+00> : vector<8x128xf32>
    %3 = tpu.matmul %0, %1, %cst {dimension_numbers = #tpu.dot_dimension_numbers<[1], [0], [0], [1], [0, 0, 1, 1], [], []>} : vector<8x32xf32>, vector<32x128xf32>, vector<8x128xf32> -> vector<8x128xf32>
    %4 = vector.broadcast %2 : vector<1x128xf32> to vector<8x128xf32>
    %5 = arith.addf %3, %4 : vector<8x128xf32>
    %cst_5 = arith.constant 0.000000e+00 : f32
    %6 = vector.broadcast %cst_5 : f32 to vector<8x128xf32>
    %7 = arith.maximumf %5, %6 : vector<8x128xf32>
    %c0_6 = arith.constant 0 : index
    %c0_7 = arith.constant 0 : index
    %8 = vector.load %arg4[%c0_6, %c0_7] : memref<128x128xf32, #tpu.memory_space<vmem>>, vector<128x128xf32>
    %c0_8 = arith.constant 0 : index
    %c0_9 = arith.constant 0 : index
    %9 = vector.load %arg5[%c0_8, %c0_9] : memref<1x128xf32, #tpu.memory_space<vmem>>, vector<1x128xf32>
    %cst_10 = arith.constant dense<0.000000e+00> : vector<8x128xf32>
    %10 = tpu.matmul %7, %8, %cst_10 {dimension_numbers = #tpu.dot_dimension_numbers<[1], [0], [0], [1], [0, 0, 1, 1], [], []>} : vector<8x128xf32>, vector<128x128xf32>, vector<8x128xf32> -> vector<8x128xf32>
    %11 = vector.broadcast %9 : vector<1x128xf32> to vector<8x128xf32>
    %12 = arith.addf %10, %11 : vector<8x128xf32>
    %13 = math.tanh %12 : vector<8x128xf32>
    %c0_11 = arith.constant 0 : index
    %c0_12 = arith.constant 0 : index
    %14 = vector.load %arg6[%c0_11, %c0_12] : memref<128x128xf32, #tpu.memory_space<vmem>>, vector<128x128xf32>
    %c0_13 = arith.constant 0 : index
    %c0_14 = arith.constant 0 : index
    %15 = vector.load %arg7[%c0_13, %c0_14] : memref<1x128xf32, #tpu.memory_space<vmem>>, vector<1x128xf32>
    %cst_15 = arith.constant dense<0.000000e+00> : vector<8x128xf32>
    %16 = tpu.matmul %13, %14, %cst_15 {dimension_numbers = #tpu.dot_dimension_numbers<[1], [0], [0], [1], [0, 0, 1, 1], [], []>} : vector<8x128xf32>, vector<128x128xf32>, vector<8x128xf32> -> vector<8x128xf32>
    %17 = vector.broadcast %15 : vector<1x128xf32> to vector<8x128xf32>
    %18 = arith.addf %16, %17 : vector<8x128xf32>
    %c0_16 = arith.constant 0 : index
    %c0_17 = arith.constant 0 : index
    %19 = vector.load %arg8[%c0_16, %c0_17] : memref<8x128xf32, #tpu.memory_space<vmem>>, vector<8x128xf32>
    tpu.vector_store %arg8[%c0_16, %c0_17], %18 {strides = array<i32>} : memref<8x128xf32, #tpu.memory_space<vmem>>, vector<8x128xf32>,
    return
  }
  func.func @transform_0(%arg0: i32) -> (i32, i32) {
    %c0_i32 = arith.constant 0 : i32
    %c0_i32_0 = arith.constant 0 : i32
    return %arg0, %c0_i32 : i32, i32
  }
  func.func @transform_1(%arg0: i32) -> (i32, i32) {
    %c0_i32 = arith.constant 0 : i32
    %c0_i32_0 = arith.constant 0 : i32
    %c0_i32_1 = arith.constant 0 : i32
    return %c0_i32, %c0_i32_0 : i32, i32
  }
  func.func @transform_2(%arg0: i32) -> (i32, i32) {
    %c0_i32 = arith.constant 0 : i32
    %c0_i32_0 = arith.constant 0 : i32
    %c0_i32_1 = arith.constant 0 : i32
    return %c0_i32, %c0_i32_0 : i32, i32
  }
  func.func @transform_3(%arg0: i32) -> (i32, i32) {
    %c0_i32 = arith.constant 0 : i32
    %c0_i32_0 = arith.constant 0 : i32
    %c0_i32_1 = arith.constant 0 : i32
    return %c0_i32, %c0_i32_0 : i32, i32
  }
  func.func @transform_4(%arg0: i32) -> (i32, i32) {
    %c0_i32 = arith.constant 0 : i32
    %c0_i32_0 = arith.constant 0 : i32
    %c0_i32_1 = arith.constant 0 : i32
    return %c0_i32, %c0_i32_0 : i32, i32
  }
  func.func @transform_5(%arg0: i32) -> (i32, i32) {
    %c0_i32 = arith.constant 0 : i32
    %c0_i32_0 = arith.constant 0 : i32
    %c0_i32_1 = arith.constant 0 : i32
    return %c0_i32, %c0_i32_0 : i32, i32
  }
  func.func @transform_6(%arg0: i32) -> (i32, i32) {
    %c0_i32 = arith.constant 0 : i32
    %c0_i32_0 = arith.constant 0 : i32
    %c0_i32_1 = arith.constant 0 : i32
    return %c0_i32, %c0_i32_0 : i32, i32
  }
  func.func @transform_7(%arg0: i32) -> (i32, i32) {
    %c0_i32 = arith.constant 0 : i32
    %c0_i32_0 = arith.constant 0 : i32
    return %arg0, %c0_i32 : i32, i32
  }
}

</mosaic_0001>

<bundles_post_ra>
// kernel: tpu_custom_call.1
= control target key start
LH: loop header
LB: loop body
LE: loop exit
PB: predicated region body
PF: predicated region fallthrough
CT: control target
= control target key end

     0   :  { %12 = vsyncpa [#allocation3], 0  ;;  %s829_s0 = inlined_call_operand.hbm [shape: f32[8,32], index: 0, kind: input, shape index: {}]   ;;  %s830_s1 = inlined_call_operand.hbm [shape: f32[32,128], index: 1, kind: input, shape index: {}]   ;;  %s831_s2 = inlined_call_operand.vmem [shape: f32[1,128], index: 2, kind: input, shape index: {}]   ;;  %s832_s3 = inlined_call_operand.hbm [shape: f32[128,128], index: 3, kind: input, shape index: {}]   ;;  %s833_s4 = inlined_call_operand.vmem [shape: f32[1,128], index: 4, kind: input, shape index: {}]   ;;  %s834_s5 = inlined_call_operand.hbm [shape: f32[128,128], index: 5, kind: input, shape index: {}]   ;;  %s835_s6 = inlined_call_operand.vmem [shape: f32[1,128], index: 6, kind: input, shape index: {}]   ;;  %s836_s7 = inlined_call_operand.hbm [shape: f32[8,128], index: 7, kind: output, shape index: {}]  }
   0x1   :  { %13 = vsyncpa [#allocation6], 0 }
   0x2   :  { %14 = vsyncpa [#allocation9], 0 }
   0x3   :  { %15 = vsyncpa [#allocation4], 0  ;;  %s680_s24 = smov [#allocation5]   ;;  %s562_s28 = scalar_lea.hbm %s830_s1, 512 }
   0x4   :  { %s31_s25 = sshll.u32 %s680_s24, 4  ;;  %p563_p0 = scmp.ne.s32.totalorder %s830_s1, %s562_s28  ;;  %s32_s25 = int_to_ptr.vmem [resolvable:$true] %s31_s25 }
   0x5   :  { %p566_p1 = scmp.lt.u32.totalorder %s562_s28, %s830_s1 }
   0x7   :  { %p568_p2 = pnand %p566_p1, %p563_p0 }
   0x9   :  { %571 = shalt.err (!%p568_p2)
}
   0xa   :  { %s572_s10 = scalar_lea.vmem %s32_s25, 512  ;;  %p577_p4 = scmp.lt.s32.totalorder %s32_s25, %s32_s25 }
   0xb   :  { %p573_p3 = scmp.ne.s32.totalorder %s32_s25, %s572_s10  ;;  %p578_p5 = scmp.lt.s32.totalorder %s572_s10, %s572_s10 }
   0xd   :  { %p579_p6 = por %p578_p5, %p577_p4 }
   0xf   :  { %p580_p7 = pnand %p579_p6, %p573_p3 }
  0x11   :  { %583 = shalt.err (!%p580_p7)
}
  0x12   :  { %s681_s11 = smov 128   ;;  %s682_s12 = smov 8  }
  0x13   :  { %37 = dma.hbm_to_vmem [thread:$0]  %s830_s1, 512, %s32_s25, [#allocation6], %s681_s11, %s681_s11, %s682_s12  }
  0x14   :  { %s683_s15 = smov [#allocation2]   ;;  %s684_s17 = smov [#allocation7]  }
  0x15   :  { %s22_s16 = sshll.u32 %s683_s15, 4  ;;  %s45_s18 = sshll.u32 %s684_s17, 4  ;;  %s23_s16 = int_to_ptr.vmem [resolvable:$true] %s22_s16  ;;  %s46_s18 = int_to_ptr.vmem [resolvable:$true] %s45_s18 }
  0x16   :  { %s584_s21 = scalar_lea.hbm %s829_s0, 128 }
  0x17   :  { %p585_p8 = scmp.ne.s32.totalorder %s829_s0, %s584_s21  ;;  %p588_p9 = scmp.lt.u32.totalorder %s584_s21, %s829_s0 }
  0x19   :  { %p590_p10 = pnand %p588_p9, %p585_p8 }
  0x1b   :  { %593 = shalt.err (!%p590_p10)
}
  0x1c   :  { %s594_s1 = scalar_lea.vmem %s23_s16, 128  ;;  %p599_p12 = scmp.lt.s32.totalorder %s23_s16, %s23_s16 }
  0x1d   :  { %p595_p11 = scmp.ne.s32.totalorder %s23_s16, %s594_s1  ;;  %p600_p13 = scmp.lt.s32.totalorder %s594_s1, %s594_s1 }
  0x1f   :  { %p601_p0 = por %p600_p13, %p599_p12 }
  0x21   :  { %p602_p1 = pnand %p601_p0, %p595_p11 }
  0x23   :  { %605 = shalt.err (!%p602_p1)
}
  0x24   :  { %25 = dma.hbm_to_vmem [thread:$0]  %s829_s0, 128, %s23_s16, [#allocation3]  }
  0x25   :  { %s606_s30 = scalar_lea.hbm %s832_s3, 2048 }
  0x26   :  { %p607_p2 = scmp.ne.s32.totalorder %s832_s3, %s606_s30  ;;  %p610_p3 = scmp.lt.u32.totalorder %s606_s30, %s832_s3 }
  0x28   :  { %p612_p4 = pnand %p610_p3, %p607_p2 }
  0x2a   :  { %615 = shalt.err (!%p612_p4)
}
  0x2b   :  { %s616_s14 = scalar_lea.vmem %s46_s18, 2048  ;;  %p621_p6 = scmp.lt.s32.totalorder %s46_s18, %s46_s18 }
  0x2c   :  { %p617_p5 = scmp.ne.s32.totalorder %s46_s18, %s616_s14  ;;  %p622_p7 = scmp.lt.s32.totalorder %s616_s14, %s616_s14 }
  0x2e   :  { %p623_p8 = por %p622_p7, %p621_p6 }
  0x30   :  { %p624_p9 = pnand %p623_p8, %p617_p5 }
  0x32   :  { %627 = shalt.err (!%p624_p9)
}
  0x33   :  { %51 = dma.hbm_to_vmem [thread:$0]  %s832_s3, 2048, %s46_s18, [#allocation6], %s681_s11, %s681_s11, %s682_s12  }
  0x34   :  { %s685_s16 = smov [#allocation8]   ;;  %s628_s21 = scalar_lea.hbm %s834_s5, 2048 }
  0x35   :  { %s59_s17 = sshll.u32 %s685_s16, 4  ;;  %p629_p10 = scmp.ne.s32.totalorder %s834_s5, %s628_s21  ;;  %s60_s17 = int_to_ptr.vmem [resolvable:$true] %s59_s17 }
  0x36   :  { %p632_p11 = scmp.lt.u32.totalorder %s628_s21, %s834_s5 }
  0x38   :  { %p634_p12 = pnand %p632_p11, %p629_p10 }
  0x3a   :  { %637 = shalt.err (!%p634_p12)
}
  0x3b   :  { %s638_s1 = scalar_lea.vmem %s60_s17, 2048  ;;  %p643_p0 = scmp.lt.s32.totalorder %s60_s17, %s60_s17 }
  0x3c   :  { %p639_p13 = scmp.ne.s32.totalorder %s60_s17, %s638_s1  ;;  %p644_p1 = scmp.lt.s32.totalorder %s638_s1, %s638_s1 }
  0x3e   :  { %p645_p2 = por %p644_p1, %p643_p0 }
  0x40   :  { %p646_p3 = pnand %p645_p2, %p639_p13 }
  0x42   :  { %649 = shalt.err (!%p646_p3)
}
  0x43   :  { %65 = dma.hbm_to_vmem [thread:$0]  %s834_s5, 2048, %s60_s17, [#allocation9], %s681_s11, %s681_s11, %s682_s12  }
  0x44   :  { %672 = dma.done.wait [#allocation3], 128  }
  0x45   :  { %673 = vsyncadd [#allocation3], 4294967168 }
  0x46   :  { %674 = dma.done.wait [#allocation6], 2560  }
  0x47   :  { %675 = vsyncadd [#allocation6], 4294964736 }
  0x48   :  { %676 = dma.done.wait [#allocation9], 2048  }
  0x49   :  { %677 = vsyncadd [#allocation9], 4294965248  ;;  %v686_v0 = vmov 0.0|0.0   ;;  %vm687_vm0 = vmmov 0   ;;  %v688_v1 = vmov 0.0   ;;  %v81_v2 = vld [vmem:[#allocation5] sm:$0xff] }
  0x4a   :  { %496 = vmatprep.subr.bf16.mxu0 %v686_v0  ;;  %423 = vmatprep.mubr.msk.f32.mxu0 %vm687_vm0, %v688_v1  ;;  %v82_v3 = vld [vmem:[#allocation5 + $0x8] sm:$0xff]  ;;  %v83_v4 = vld [vmem:[#allocation5 + $0x10] sm:$0xff]  ;;  %v84_v6 = vld [vmem:[#allocation5 + $0x18] sm:$0xff]  ;;  %vm92_vm1 = vcmask 261120   ;;  %s689_s28 = smov [#allocation10]  }
  0x4b   :  { %502 = vmatprep.subr.bf16.mxu1 %v686_v0  ;;  %458 = vmatprep.mubr.msk.f32.mxu1 %vm687_vm0, %v688_v1  ;;  %v497_v5 = vpack.c.bf16 %v82_v3, %v81_v2  ;;  %v167_v7 = vld [vmem:[#allocation7] sm:$0xff]  ;;  %v168_v8 = vld [vmem:[#allocation7 + $0x8] sm:$0xff]  ;;  %v169_v9 = vld [vmem:[#allocation7 + $0x10] sm:$0xff]  ;;  %v500_v11 = vpack.c.bf16 %v84_v6, %v83_v4  ;;  %s361_s29 = sshll.u32 %s689_s28, 4  ;;  %s362_s29 = int_to_ptr.vmem [resolvable:$true] %s361_s29 }
  0x4c   :  { %v170_v10 = vld [vmem:[#allocation7 + $0x18] sm:$0xff]  ;;  %v503_v12 = vpack.c.bf16 %v168_v8, %v167_v7  ;;  %v171_v14 = vld [vmem:[#allocation7 + $0x20] sm:$0xff]  ;;  %v172_v15 = vld [vmem:[#allocation7 + $0x28] sm:$0xff]  ;;  %s650_s30 = scalar_lea.vmem %s362_s29, 128  ;;  %p655_p5 = scmp.lt.s32.totalorder %s362_s29, %s362_s29 }
  0x4d   :  { %498 = vmatpush3.bf16.msra.mxu0 %v497_v5  ;;  %v506_v13 = vpack.c.bf16 %v170_v10, %v169_v9  ;;  %v80_v16 = vld [vmem:[#allocation2] sm:$0xff]  ;;  %v509_v17 = vpack.c.bf16 %v172_v15, %v171_v14  ;;  %v173_v18 = vld [vmem:[#allocation7 + $0x30] sm:$0xff]  ;;  %v175_v21 = vld [vmem:[#allocation7 + $0x40] sm:$0xff]  ;;  %p651_p4 = scmp.ne.s32.totalorder %s362_s29, %s650_s30  ;;  %p656_p6 = scmp.lt.s32.totalorder %s650_s30, %s650_s30 }
  0x4e   :  { %499 = vmatprep.subr.bf16.mxu0 %v686_v0  ;;  %504 = vmatpush3.bf16.msra.mxu1 %v503_v12  ;;  %v174_v19 = vld [vmem:[#allocation7 + $0x38] sm:$0xff]  ;;  %v176_v22 = vld [vmem:[#allocation7 + $0x48] sm:$0xff]  ;;  %v177_v24 = vld [vmem:[#allocation7 + $0x50] sm:$0xff] }
  0x4f   :  { %505 = vmatprep.subr.bf16.mxu1 %v686_v0  ;;  %v512_v20 = vpack.c.bf16 %v174_v19, %v173_v18  ;;  %v515_v23 = vpack.c.bf16 %v176_v22, %v175_v21  ;;  %v178_v25 = vld [vmem:[#allocation7 + $0x58] sm:$0xff]  ;;  %v179_v27 = vld [vmem:[#allocation7 + $0x60] sm:$0xff]  ;;  %v180_v28 = vld [vmem:[#allocation7 + $0x68] sm:$0xff]  ;;  %p657_p7 = por %p656_p6, %p655_p5 }
  0x50   :  { %v518_v26 = vpack.c.bf16 %v178_v25, %v177_v24  ;;  %v521_v29 = vpack.c.bf16 %v180_v28, %v179_v27  ;;  %v181_v30 = vld [vmem:[#allocation7 + $0x70] sm:$0xff]  ;;  %v182_v31 = vld [vmem:[#allocation7 + $0x78] sm:$0xff]  ;;  %v261_v33 = vld [vmem:[#allocation8] sm:$0xff] }
  0x51   :  { %501 = vmatpush3.bf16.msra.mxu0 %v500_v11  ;;  %v524_v32 = vpack.c.bf16 %v182_v31, %v181_v30  ;;  %v262_v34 = vld [vmem:[#allocation8 + $0x8] sm:$0xff]  ;;  %v263_v35 = vld [vmem:[#allocation8 + $0x10] sm:$0xff]  ;;  %v264_v37 = vld [vmem:[#allocation8 + $0x18] sm:$0xff]  ;;  %p658_p8 = pnand %p657_p7, %p651_p4 }
  0x52   :  { %526 = vmatprep.subr.bf16.mxu0 %v686_v0  ;;  %507 = vmatpush3.bf16.msra.mxu1 %v506_v13  ;;  %v527_v36 = vpack.c.bf16 %v262_v34, %v261_v33  ;;  %v530_v38 = vpack.c.bf16 %v264_v37, %v263_v35  ;;  %v265_v39 = vld [vmem:[#allocation8 + $0x20] sm:$0xff]  ;;  %v266_v40 = vld [vmem:[#allocation8 + $0x28] sm:$0xff]  ;;  %v267_v42 = vld [vmem:[#allocation8 + $0x30] sm:$0xff] }
  0x53   :  { %508 = vmatprep.subr.bf16.mxu1 %v686_v0  ;;  %v533_v41 = vpack.c.bf16 %v266_v40, %v265_v39  ;;  %v268_v43 = vld [vmem:[#allocation8 + $0x38] sm:$0xff]  ;;  %v269_v45 = vld [vmem:[#allocation8 + $0x40] sm:$0xff]  ;;  %v270_v46 = vld [vmem:[#allocation8 + $0x48] sm:$0xff] }
  0x54   :  { %424 = vmatmul.mubr.msk.f32.vlgmr.msra.gmra.mrb[0].mxu0 %vm92_vm1, %v80_v16  ;;  %v536_v44 = vpack.c.bf16 %v268_v43, %v267_v42  ;;  %v539_v47 = vpack.c.bf16 %v270_v46, %v269_v45  ;;  %v372_v48 = vld [vmem:[%s831_s2] ss:$0 sm:$0xff]  ;;  %v271_v53 = vld [vmem:[#allocation8 + $0x50] sm:$0xff]  ;;  %v273_v56 = vld [vmem:[#allocation8 + $0x60] sm:$0xff] }
  0x55   :  { %493 = vmatprep.mubr.msk.f32.mxu0 %vm687_vm0, %v688_v1  ;;  %528 = vmatpush3.bf16.msra.mxu0 %v527_v36  ;;  %v272_v54 = vld [vmem:[#allocation8 + $0x58] sm:$0xff]  ;;  %v274_v57 = vld [vmem:[#allocation8 + $0x68] sm:$0xff]  ;;  %v275_v59 = vld [vmem:[#allocation8 + $0x70] sm:$0xff] }
  0x56   :  { %510 = vmatpush3.bf16.msra.mxu1 %v509_v17  ;;  %529 = vmatprep.subr.bf16.mxu0 %v686_v0  ;;  %v542_v55 = vpack.c.bf16 %v272_v54, %v271_v53  ;;  %v545_v58 = vpack.c.bf16 %v274_v57, %v273_v56  ;;  %v276_v60 = vld [vmem:[#allocation8 + $0x78] sm:$0xff] }
  0x57   :  { %511 = vmatprep.subr.bf16.mxu1 %v686_v0  ;;  %v548_v61 = vpack.c.bf16 %v276_v60, %v275_v59  ;;  %v374_v62 = vld [vmem:[%s833_s4] ss:$0 sm:$0xff] }
  0x58   :  { %v375_v4 = vld [vmem:[%s835_s6] ss:$0 sm:$0xff] }
  0x59   :  { %531 = vmatpush3.bf16.msra.mxu0 %v530_v38 }
  0x5a   :  { %513 = vmatpush3.bf16.msra.mxu1 %v512_v20  ;;  %532 = vmatprep.subr.bf16.mxu0 %v686_v0 }
  0x5b   :  { %514 = vmatprep.subr.bf16.mxu1 %v686_v0 }
  0x5d   :  { %534 = vmatpush3.bf16.msra.mxu0 %v533_v41 }
  0x5e   :  { %516 = vmatpush3.bf16.msra.mxu1 %v515_v23  ;;  %535 = vmatprep.subr.bf16.mxu0 %v686_v0 }
  0x5f   :  { %517 = vmatprep.subr.bf16.mxu1 %v686_v0 }
  0x61   :  { %537 = vmatpush3.bf16.msra.mxu0 %v536_v44 }
  0x62   :  { %519 = vmatpush3.bf16.msra.mxu1 %v518_v26  ;;  %538 = vmatprep.subr.bf16.mxu0 %v686_v0 }
  0x63   :  { %520 = vmatprep.subr.bf16.mxu1 %v686_v0 }
  0x65   :  { %540 = vmatpush3.bf16.msra.mxu0 %v539_v47 }
  0x66   :  { %522 = vmatpush3.bf16.msra.mxu1 %v521_v29  ;;  %541 = vmatprep.subr.bf16.mxu0 %v686_v0 }
  0x67   :  { %523 = vmatprep.subr.bf16.mxu1 %v686_v0 }
  0x69   :  { %543 = vmatpush3.bf16.msra.mxu0 %v542_v55 }
  0x6a   :  { %525 = vmatpush3.bf16.msra.mxu1 %v524_v32  ;;  %544 = vmatprep.subr.bf16.mxu0 %v686_v0 }
  0x6d   :  { %546 = vmatpush3.bf16.msra.mxu0 %v545_v58 }
  0x6e   :  { %547 = vmatprep.subr.bf16.mxu0 %v686_v0 }
  0x71   :  { %549 = vmatpush3.bf16.msra.mxu0 %v548_v61 }
 0x127   :  { %v162_v49 = vpop.f32.mrb[0].mxu0 }
 0x128   :  { %v163_v50 = vadd.f32 %v372_v48, %v162_v49  ;;  %v425_v51 = vpop.f32.mrb[1].mxu0 }
 0x12a   :  { %v166_v52 = vmax.f32 %v163_v50, 0.0 }
 0x12c   :  { %459 = vmatmul.mubr.f32.vlgmr.msra.gmra.mrb[0].mxu1 %v166_v52 }
 0x1ff   :  { %v256_v63 = vpop.f32.mrb[0].mxu1 }
 0x200   :  { %v257_v1 = vadd.f32 %v374_v62, %v256_v63  ;;  %v460_v2 = vpop.f32.mrb[1].mxu1 }
 0x202   :  { %560 = vtanh.f32 %v257_v1 }
 0x20c   :  { %v561_v3 = vpop.eup %560 }
 0x20d   :  { %494 = vmatmul.mubr.f32.vlgmr.msra.gmra.mrb[2].mxu0 %v561_v3 }
 0x2e0   :  { %v350_v5 = vpop.f32.mrb[2].mxu0 }
 0x2e1   :  { %v351_v6 = vadd.f32 %v375_v4, %v350_v5  ;;  %v495_v0 = vpop.f32.mrb[3].mxu0 }
 0x2e3   :  { %354 = vst [vmem:[#allocation10] sm:$0xff] %v351_v6 }
 0x2e4   :  { %661 = shalt.err (!%p658_p8)
}
 0x2e5   :  { %s662_s9 = scalar_lea.hbm %s836_s7, 128 }
 0x2e6   :  { %p663_p9 = scmp.ne.s32.totalorder %s836_s7, %s662_s9  ;;  %p666_p10 = scmp.lt.u32.totalorder %s662_s9, %s836_s7 }
 0x2e8   :  { %p668_p11 = pnand %p666_p10, %p663_p9 }
 0x2ea   :  { %671 = shalt.err (!%p668_p11)
}
 0x2eb   :  { %364 = dma.vmem_to_hbm [thread:$0]  %s362_s29, 128, %s836_s7, [#allocation4]  }
 0x2ec   :  { %678 = dma.done.wait [#allocation4], 128  }
 0x2ed   :  { %679 = vsyncadd [#allocation4], 4294967168 }
 0x2ee   :  { %368 = vsyncpa [#allocation3], 1 }
 0x2ef   :  { %369 = vsyncpa [#allocation6], 1 }
 0x2f0   :  { %370 = vsyncpa [#allocation9], 1 }
 0x2f1   :  { %371 = vsyncpa [#allocation4], 1 }

// kernel: tpu_custom_call.1
= control target key start
LH: loop header
LB: loop body
LE: loop exit
PB: predicated region body
PF: predicated region fallthrough
CT: control target
= control target key end

     0   :  { %12 = vsyncpa [#allocation3], 0  ;;  %s829_s0 = inlined_call_operand.hbm [shape: f32[8,32], index: 0, kind: input, shape index: {}]   ;;  %s830_s1 = inlined_call_operand.hbm [shape: f32[32,128], index: 1, kind: input, shape index: {}]   ;;  %s831_s2 = inlined_call_operand.vmem [shape: f32[1,128], index: 2, kind: input, shape index: {}]   ;;  %s832_s3 = inlined_call_operand.hbm [shape: f32[128,128], index: 3, kind: input, shape index: {}]   ;;  %s833_s4 = inlined_call_operand.vmem [shape: f32[1,128], index: 4, kind: input, shape index: {}]   ;;  %s834_s5 = inlined_call_operand.hbm [shape: f32[128,128], index: 5, kind: input, shape index: {}]   ;;  %s835_s6 = inlined_call_operand.vmem [shape: f32[1,128], index: 6, kind: input, shape index: {}]   ;;  %s836_s7 = inlined_call_operand.hbm [shape: f32[8,128], index: 7, kind: output, shape index: {}]  }
   0x1   :  { %13 = vsyncpa [#allocation6], 0 }
   0x2   :  { %14 = vsyncpa [#allocation9], 0 }
   0x3   :  { %15 = vsyncpa [#allocation4], 0  ;;  %s680_s24 = smov [#allocation5]   ;;  %s562_s28 = scalar_lea.hbm %s830_s1, 512 }
   0x4   :  { %s31_s25 = sshll.u32 %s680_s24, 4  ;;  %p563_p0 = scmp.ne.s32.totalorder %s830_s1, %s562_s28  ;;  %s32_s25 = int_to_ptr.vmem [resolvable:$true] %s31_s25 }
   0x5   :  { %p566_p1 = scmp.lt.u32.totalorder %s562_s28, %s830_s1 }
   0x7   :  { %p568_p2 = pnand %p566_p1, %p563_p0 }
   0x9   :  { %571 = shalt.err (!%p568_p2)
}
   0xa   :  { %s572_s10 = scalar_lea.vmem %s32_s25, 512  ;;  %p577_p4 = scmp.lt.s32.totalorder %s32_s25, %s32_s25 }
   0xb   :  { %p573_p3 = scmp.ne.s32.totalorder %s32_s25, %s572_s10  ;;  %p578_p5 = scmp.lt.s32.totalorder %s572_s10, %s572_s10 }
   0xd   :  { %p579_p6 = por %p578_p5, %p577_p4 }
   0xf   :  { %p580_p7 = pnand %p579_p6, %p573_p3 }
  0x11   :  { %583 = shalt.err (!%p580_p7)
}
  0x12   :  { %s681_s11 = smov 128   ;;  %s682_s12 = smov 8  }
  0x13   :  { %37 = dma.hbm_to_vmem [thread:$0]  %s830_s1, 512, %s32_s25, [#allocation6], %s681_s11, %s681_s11, %s682_s12  }
  0x14   :  { %s683_s15 = smov [#allocation2]   ;;  %s684_s17 = smov [#allocation7]  }
  0x15   :  { %s22_s16 = sshll.u32 %s683_s15, 4  ;;  %s45_s18 = sshll.u32 %s684_s17, 4  ;;  %s23_s16 = int_to_ptr.vmem [resolvable:$true] %s22_s16  ;;  %s46_s18 = int_to_ptr.vmem [resolvable:$true] %s45_s18 }
  0x16   :  { %s584_s21 = scalar_lea.hbm %s829_s0, 128 }
  0x17   :  { %p585_p8 = scmp.ne.s32.totalorder %s829_s0, %s584_s21  ;;  %p588_p9 = scmp.lt.u32.totalorder %s584_s21, %s829_s0 }
  0x19   :  { %p590_p10 = pnand %p588_p9, %p585_p8 }
  0x1b   :  { %593 = shalt.err (!%p590_p10)
}
  0x1c   :  { %s594_s1 = scalar_lea.vmem %s23_s16, 128  ;;  %p599_p12 = scmp.lt.s32.totalorder %s23_s16, %s23_s16 }
  0x1d   :  { %p595_p11 = scmp.ne.s32.totalorder %s23_s16, %s594_s1  ;;  %p600_p13 = scmp.lt.s32.totalorder %s594_s1, %s594_s1 }
  0x1f   :  { %p601_p0 = por %p600_p13, %p599_p12 }
  0x21   :  { %p602_p1 = pnand %p601_p0, %p595_p11 }
  0x23   :  { %605 = shalt.err (!%p602_p1)
}
  0x24   :  { %25 = dma.hbm_to_vmem [thread:$0]  %s829_s0, 128, %s23_s16, [#allocation3]  }
  0x25   :  { %s606_s30 = scalar_lea.hbm %s832_s3, 2048 }
  0x26   :  { %p607_p2 = scmp.ne.s32.totalorder %s832_s3, %s606_s30  ;;  %p610_p3 = scmp.lt.u32.totalorder %s606_s30, %s832_s3 }
  0x28   :  { %p612_p4 = pnand %p610_p3, %p607_p2 }
  0x2a   :  { %615 = shalt.err (!%p612_p4)
}
  0x2b   :  { %s616_s14 = scalar_lea.vmem %s46_s18, 2048  ;;  %p621_p6 = scmp.lt.s32.totalorder %s46_s18, %s46_s18 }
  0x2c   :  { %p617_p5 = scmp.ne.s32.totalorder %s46_s18, %s616_s14  ;;  %p622_p7 = scmp.lt.s32.totalorder %s616_s14, %s616_s14 }
  0x2e   :  { %p623_p8 = por %p622_p7, %p621_p6 }
  0x30   :  { %p624_p9 = pnand %p623_p8, %p617_p5 }
  0x32   :  { %627 = shalt.err (!%p624_p9)
}
  0x33   :  { %51 = dma.hbm_to_vmem [thread:$0]  %s832_s3, 2048, %s46_s18, [#allocation6], %s681_s11, %s681_s11, %s682_s12  }
  0x34   :  { %s685_s16 = smov [#allocation8]   ;;  %s628_s21 = scalar_lea.hbm %s834_s5, 2048 }
  0x35   :  { %s59_s17 = sshll.u32 %s685_s16, 4  ;;  %p629_p10 = scmp.ne.s32.totalorder %s834_s5, %s628_s21  ;;  %s60_s17 = int_to_ptr.vmem [resolvable:$true] %s59_s17 }
  0x36   :  { %p632_p11 = scmp.lt.u32.totalorder %s628_s21, %s834_s5 }
  0x38   :  { %p634_p12 = pnand %p632_p11, %p629_p10 }
  0x3a   :  { %637 = shalt.err (!%p634_p12)
}
  0x3b   :  { %s638_s1 = scalar_lea.vmem %s60_s17, 2048  ;;  %p643_p0 = scmp.lt.s32.totalorder %s60_s17, %s60_s17 }
  0x3c   :  { %p639_p13 = scmp.ne.s32.totalorder %s60_s17, %s638_s1  ;;  %p644_p1 = scmp.lt.s32.totalorder %s638_s1, %s638_s1 }
  0x3e   :  { %p645_p2 = por %p644_p1, %p643_p0 }
  0x40   :  { %p646_p3 = pnand %p645_p2, %p639_p13 }
  0x42   :  { %649 = shalt.err (!%p646_p3)
}
  0x43   :  { %65 = dma.hbm_to_vmem [thread:$0]  %s834_s5, 2048, %s60_s17, [#allocation9], %s681_s11, %s681_s11, %s682_s12  }
  0x44   :  { %672 = dma.done.wait [#allocation3], 128  }
  0x45   :  { %673 = vsyncadd [#allocation3], 4294967168 }
  0x46   :  { %674 = dma.done.wait [#allocation6], 2560  }
  0x47   :  { %675 = vsyncadd [#allocation6], 4294964736 }
  0x48   :  { %676 = dma.done.wait [#allocation9], 2048  }
  0x49   :  { %677 = vsyncadd [#allocation9], 4294965248  ;;  %v686_v0 = vmov 0.0|0.0   ;;  %vm687_vm0 = vmmov 0   ;;  %v688_v1 = vmov 0.0   ;;  %v81_v2 = vld [vmem:[#allocation5] sm:$0xff] }
  0x4a   :  { %496 = vmatprep.subr.bf16.mxu0 %v686_v0  ;;  %423 = vmatprep.mubr.msk.f32.mxu0 %vm687_vm0, %v688_v1  ;;  %v82_v3 = vld [vmem:[#allocation5 + $0x8] sm:$0xff]  ;;  %v83_v4 = vld [vmem:[#allocation5 + $0x10] sm:$0xff]  ;;  %v84_v6 = vld [vmem:[#allocation5 + $0x18] sm:$0xff]  ;;  %vm92_vm1 = vcmask 261120   ;;  %s689_s28 = smov [#allocation10]  }
  0x4b   :  { %502 = vmatprep.subr.bf16.mxu1 %v686_v0  ;;  %458 = vmatprep.mubr.msk.f32.mxu1 %vm687_vm0, %v688_v1  ;;  %v497_v5 = vpack.c.bf16 %v82_v3, %v81_v2  ;;  %v167_v7 = vld [vmem:[#allocation7] sm:$0xff]  ;;  %v168_v8 = vld [vmem:[#allocation7 + $0x8] sm:$0xff]  ;;  %v169_v9 = vld [vmem:[#allocation7 + $0x10] sm:$0xff]  ;;  %v500_v11 = vpack.c.bf16 %v84_v6, %v83_v4  ;;  %s361_s29 = sshll.u32 %s689_s28, 4  ;;  %s362_s29 = int_to_ptr.vmem [resolvable:$true] %s361_s29 }
  0x4c   :  { %v170_v10 = vld [vmem:[#allocation7 + $0x18] sm:$0xff]  ;;  %v503_v12 = vpack.c.bf16 %v168_v8, %v167_v7  ;;  %v171_v14 = vld [vmem:[#allocation7 + $0x20] sm:$0xff]  ;;  %v172_v15 = vld [vmem:[#allocation7 + $0x28] sm:$0xff]  ;;  %s650_s30 = scalar_lea.vmem %s362_s29, 128  ;;  %p655_p5 = scmp.lt.s32.totalorder %s362_s29, %s362_s29 }
  0x4d   :  { %498 = vmatpush3.bf16.msra.mxu0 %v497_v5  ;;  %v506_v13 = vpack.c.bf16 %v170_v10, %v169_v9  ;;  %v80_v16 = vld [vmem:[#allocation2] sm:$0xff]  ;;  %v509_v17 = vpack.c.bf16 %v172_v15, %v171_v14  ;;  %v173_v18 = vld [vmem:[#allocation7 + $0x30] sm:$0xff]  ;;  %v175_v21 = vld [vmem:[#allocation7 + $0x40] sm:$0xff]  ;;  %p651_p4 = scmp.ne.s32.totalorder %s362_s29, %s650_s30  ;;  %p656_p6 = scmp.lt.s32.totalorder %s650_s30, %s650_s30 }
  0x4e   :  { %499 = vmatprep.subr.bf16.mxu0 %v686_v0  ;;  %504 = vmatpush3.bf16.msra.mxu1 %v503_v12  ;;  %v174_v19 = vld [vmem:[#allocation7 + $0x38] sm:$0xff]  ;;  %v176_v22 = vld [vmem:[#allocation7 + $0x48] sm:$0xff]  ;;  %v177_v24 = vld [vmem:[#allocation7 + $0x50] sm:$0xff] }
  0x4f   :  { %505 = vmatprep.subr.bf16.mxu1 %v686_v0  ;;  %v512_v20 = vpack.c.bf16 %v174_v19, %v173_v18  ;;  %v515_v23 = vpack.c.bf16 %v176_v22, %v175_v21  ;;  %v178_v25 = vld [vmem:[#allocation7 + $0x58] sm:$0xff]  ;;  %v179_v27 = vld [vmem:[#allocation7 + $0x60] sm:$0xff]  ;;  %v180_v28 = vld [vmem:[#allocation7 + $0x68] sm:$0xff]  ;;  %p657_p7 = por %p656_p6, %p655_p5 }
  0x50   :  { %v518_v26 = vpack.c.bf16 %v178_v25, %v177_v24  ;;  %v521_v29 = vpack.c.bf16 %v180_v28, %v179_v27  ;;  %v181_v30 = vld [vmem:[#allocation7 + $0x70] sm:$0xff]  ;;  %v182_v31 = vld [vmem:[#allocation7 + $0x78] sm:$0xff]  ;;  %v261_v33 = vld [vmem:[#allocation8] sm:$0xff] }
  0x51   :  { %501 = vmatpush3.bf16.msra.mxu0 %v500_v11  ;;  %v524_v32 = vpack.c.bf16 %v182_v31, %v181_v30  ;;  %v262_v34 = vld [vmem:[#allocation8 + $0x8] sm:$0xff]  ;;  %v263_v35 = vld [vmem:[#allocation8 + $0x10] sm:$0xff]  ;;  %v264_v37 = vld [vmem:[#allocation8 + $0x18] sm:$0xff]  ;;  %p658_p8 = pnand %p657_p7, %p651_p4 }
  0x52   :  { %526 = vmatprep.subr.bf16.mxu0 %v686_v0  ;;  %507 = vmatpush3.bf16.msra.mxu1 %v506_v13  ;;  %v527_v36 = vpack.c.bf16 %v262_v34, %v261_v33  ;;  %v530_v38 = vpack.c.bf16 %v264_v37, %v263_v35  ;;  %v265_v39 = vld [vmem:[#allocation8 + $0x20] sm:$0xff]  ;;  %v266_v40 = vld [vmem:[#allocation8 + $0x28] sm:$0xff]  ;;  %v267_v42 = vld [vmem:[#allocation8 + $0x30] sm:$0xff] }
  0x53   :  { %508 = vmatprep.subr.bf16.mxu1 %v686_v0  ;;  %v533_v41 = vpack.c.bf16 %v266_v40, %v265_v39  ;;  %v268_v43 = vld [vmem:[#allocation8 + $0x38] sm:$0xff]  ;;  %v269_v45 = vld [vmem:[#allocation8 + $0x40] sm:$0xff]  ;;  %v270_v46 = vld [vmem:[#allocation8 + $0x48] sm:$0xff] }
  0x54   :  { %424 = vmatmul.mubr.msk.f32.vlgmr.msra.gmra.mrb[0].mxu0 %vm92_vm1, %v80_v16  ;;  %v536_v44 = vpack.c.bf16 %v268_v43, %v267_v42  ;;  %v539_v47 = vpack.c.bf16 %v270_v46, %v269_v45  ;;  %v372_v48 = vld [vmem:[%s831_s2] ss:$0 sm:$0xff]  ;;  %v271_v53 = vld [vmem:[#allocation8 + $0x50] sm:$0xff]  ;;  %v273_v56 = vld [vmem:[#allocation8 + $0x60] sm:$0xff] }
  0x55   :  { %493 = vmatprep.mubr.msk.f32.mxu0 %vm687_vm0, %v688_v1  ;;  %528 = vmatpush3.bf16.msra.mxu0 %v527_v36  ;;  %v272_v54 = vld [vmem:[#allocation8 + $0x58] sm:$0xff]  ;;  %v274_v57 = vld [vmem:[#allocation8 + $0x68] sm:$0xff]  ;;  %v275_v59 = vld [vmem:[#allocation8 + $0x70] sm:$0xff] }
  0x56   :  { %510 = vmatpush3.bf16.msra.mxu1 %v509_v17  ;;  %529 = vmatprep.subr.bf16.mxu0 %v686_v0  ;;  %v542_v55 = vpack.c.bf16 %v272_v54, %v271_v53  ;;  %v545_v58 = vpack.c.bf16 %v274_v57, %v273_v56  ;;  %v276_v60 = vld [vmem:[#allocation8 + $0x78] sm:$0xff] }
  0x57   :  { %511 = vmatprep.subr.bf16.mxu1 %v686_v0  ;;  %v548_v61 = vpack.c.bf16 %v276_v60, %v275_v59  ;;  %v374_v62 = vld [vmem:[%s833_s4] ss:$0 sm:$0xff] }
  0x58   :  { %v375_v4 = vld [vmem:[%s835_s6] ss:$0 sm:$0xff] }
  0x59   :  { %531 = vmatpush3.bf16.msra.mxu0 %v530_v38 }
  0x5a   :  { %513 = vmatpush3.bf16.msra.mxu1 %v512_v20  ;;  %532 = vmatprep.subr.bf16.mxu0 %v686_v0 }
  0x5b   :  { %514 = vmatprep.subr.bf16.mxu1 %v686_v0 }
  0x5d   :  { %534 = vmatpush3.bf16.msra.mxu0 %v533_v41 }
  0x5e   :  { %516 = vmatpush3.bf16.msra.mxu1 %v515_v23  ;;  %535 = vmatprep.subr.bf16.mxu0 %v686_v0 }
  0x5f   :  { %517 = vmatprep.subr.bf16.mxu1 %v686_v0 }
  0x61   :  { %537 = vmatpush3.bf16.msra.mxu0 %v536_v44 }
  0x62   :  { %519 = vmatpush3.bf16.msra.mxu1 %v518_v26  ;;  %538 = vmatprep.subr.bf16.mxu0 %v686_v0 }
  0x63   :  { %520 = vmatprep.subr.bf16.mxu1 %v686_v0 }
  0x65   :  { %540 = vmatpush3.bf16.msra.mxu0 %v539_v47 }
  0x66   :  { %522 = vmatpush3.bf16.msra.mxu1 %v521_v29  ;;  %541 = vmatprep.subr.bf16.mxu0 %v686_v0 }
  0x67   :  { %523 = vmatprep.subr.bf16.mxu1 %v686_v0 }
  0x69   :  { %543 = vmatpush3.bf16.msra.mxu0 %v542_v55 }
  0x6a   :  { %525 = vmatpush3.bf16.msra.mxu1 %v524_v32  ;;  %544 = vmatprep.subr.bf16.mxu0 %v686_v0 }
  0x6d   :  { %546 = vmatpush3.bf16.msra.mxu0 %v545_v58 }
  0x6e   :  { %547 = vmatprep.subr.bf16.mxu0 %v686_v0 }
  0x71   :  { %549 = vmatpush3.bf16.msra.mxu0 %v548_v61 }
 0x127   :  { %v162_v49 = vpop.f32.mrb[0].mxu0 }
 0x128   :  { %v163_v50 = vadd.f32 %v372_v48, %v162_v49  ;;  %v425_v51 = vpop.f32.mrb[1].mxu0 }
 0x12a   :  { %v166_v52 = vmax.f32 %v163_v50, 0.0 }
 0x12c   :  { %459 = vmatmul.mubr.f32.vlgmr.msra.gmra.mrb[0].mxu1 %v166_v52 }
 0x1ff   :  { %v256_v63 = vpop.f32.mrb[0].mxu1 }
 0x200   :  { %v257_v1 = vadd.f32 %v374_v62, %v256_v63  ;;  %v460_v2 = vpop.f32.mrb[1].mxu1 }
 0x202   :  { %560 = vtanh.f32 %v257_v1 }
 0x20c   :  { %v561_v3 = vpop.eup %560 }
 0x20d   :  { %494 = vmatmul.mubr.f32.vlgmr.msra.gmra.mrb[2].mxu0 %v561_v3 }
 0x2e0   :  { %v350_v5 = vpop.f32.mrb[2].mxu0 }
 0x2e1   :  { %v351_v6 = vadd.f32 %v375_v4, %v350_v5  ;;  %v495_v0 = vpop.f32.mrb[3].mxu0 }
 0x2e3   :  { %354 = vst [vmem:[#allocation10] sm:$0xff] %v351_v6 }
 0x2e4   :  { %661 = shalt.err (!%p658_p8)
}
 0x2e5   :  { %s662_s9 = scalar_lea.hbm %s836_s7, 128 }
 0x2e6   :  { %p663_p9 = scmp.ne.s32.totalorder %s836_s7, %s662_s9  ;;  %p666_p10 = scmp.lt.u32.totalorder %s662_s9, %s836_s7 }
 0x2e8   :  { %p668_p11 = pnand %p666_p10, %p663_p9 }
 0x2ea   :  { %671 = shalt.err (!%p668_p11)
}
 0x2eb   :  { %364 = dma.vmem_to_hbm [thread:$0]  %s362_s29, 128, %s836_s7, [#allocation4]  }
 0x2ec   :  { %678 = dma.done.wait [#allocation4], 128  }
 0x2ed   :  { %679 = vsyncadd [#allocation4], 4294967168 }
 0x2ee   :  { %368 = vsyncpa [#allocation3], 1 }
 0x2ef   :  { %369 = vsyncpa [#allocation6], 1 }
 0x2f0   :  { %370 = vsyncpa [#allocation9], 1 }
 0x2f1   :  { %371 = vsyncpa [#allocation4], 1 }

</bundles_post_ra>
